<compile_context>
chip_gen: v6e
topology: v6e:2x2x1
jax: 0.10.0
libtpu: 0.0.40
codegen_flags: <defaults>
</compile_context>

<pallas_src>
import functools

import jax
import jax.numpy as jnp
from jax.experimental import pallas as pl
from jax.experimental.pallas import tpu as pltpu

EPS = 1e-5                      # GlobalLayerNorm eps (Conv-TasNet default)
VMEM_LIMIT = 64 * 1024 * 1024   # generous scoped-VMEM cap (working set << this)


def _round_up(v, m):
    return (v + m - 1) // m * m


# --------------------------------------------------------------------------
# Stage 1: conv1x1 + PReLU1 + mask, per-tile gLN1 partial sums
# --------------------------------------------------------------------------
def _stage1_kernel(x_ref, w1_ref, b1_ref, a1_ref,
                   y_ref, s_ref, ss_ref, *, t_valid, tile_t):
    t = pl.program_id(1)
    y = jnp.dot(w1_ref[...], x_ref[0].astype(jnp.bfloat16),
                preferred_element_type=jnp.float32) + b1_ref[...]
    t_idx = t * tile_t + jax.lax.broadcasted_iota(jnp.int32, (1, tile_t), 1)
    valid = t_idx < t_valid
    a1 = a1_ref[0, 0]                                  # scalar from SMEM
    y = jnp.where(y > 0, y, a1 * y)                    # PReLU1
    y = jnp.where(valid, y, 0.0)                       # drop padded columns
    y_ref[0] = y.astype(y_ref.dtype)
    s_ref[0, 0] = jnp.full((1, 128), jnp.sum(y), jnp.float32)
    ss_ref[0, 0] = jnp.full((1, 128), jnp.sum(y * y), jnp.float32)


# --------------------------------------------------------------------------
# Stage 2: gLN1 apply + depthwise conv (haloed) + PReLU2 + mask, gLN2 partials
# --------------------------------------------------------------------------
def _stage2_kernel(yc_ref, yp_ref, yn_ref, sc1_ref, sh1_ref, wd_ref, bd_ref,
                   a2_ref, y2_ref, s_ref, ss_ref,
                   *, t_valid, tile_t, pad, dilation, kernel_size, halo):
    t = pl.program_id(1)
    yc = yc_ref[0]                                     # (C, Tt)
    if pad > 0:
        yl = yp_ref[0][:, halo - pad:]                 # (C, pad) left halo
        yr = yn_ref[0][:, :pad]                        # (C, pad) right halo
        y_ext = jnp.concatenate([yl, yc, yr], axis=1)  # (C, Tt + 2*pad)
    else:
        y_ext = yc
    text = tile_t + 2 * pad

    t_idx = (t * tile_t - pad
             + jax.lax.broadcasted_iota(jnp.int32, (1, text), 1))
    valid = (t_idx >= 0) & (t_idx < t_valid)

    # gLN1 apply (per-sample scale/shift precomputed on host), fused with the
    # zero mask that doubles as the depthwise conv's zero padding.
    z = jnp.where(valid, y_ext * sc1_ref[0] + sh1_ref[0], 0.0)

    # Depthwise conv: accumulator initialised with tap 0 + bias (saves passes).
    acc = wd_ref[0] * z[:, 0:tile_t] + bd_ref[...]
    for k in range(1, kernel_size):
        off = k * dilation
        acc = acc + wd_ref[k] * z[:, off:off + tile_t]

    a2 = a2_ref[0, 0].astype(acc.dtype)                # scalar from SMEM
    y2 = jnp.where(acc > 0, acc, a2 * acc)             # PReLU2
    y2 = jnp.where(valid[:, pad:pad + tile_t], y2, 0.0)
    y2_ref[0] = y2.astype(y2_ref.dtype)

    y2f = y2.astype(jnp.float32)                       # one upcast, reused
    s_ref[0, 0] = jnp.full((1, 128), jnp.sum(y2f), jnp.float32)
    ss_ref[0, 0] = jnp.full((1, 128), jnp.sum(y2f * y2f), jnp.float32)


# --------------------------------------------------------------------------
# Stage 3: folded (gLN2 + sconv) matmul + bias + residual
# --------------------------------------------------------------------------
def _stage3_kernel(ws_ref, be_ref, y2_ref, x_ref, o_ref):
    out = jnp.dot(ws_ref[0], y2_ref[0].astype(jnp.bfloat16),
                  preferred_element_type=jnp.float32)
    o_ref[0] = (out + be_ref[0] + x_ref[0].astype(jnp.float32)).astype(o_ref.dtype)


# --------------------------------------------------------------------------
# Wrapper
# --------------------------------------------------------------------------
def tcn_block_spk_no_aux(x, aux, params, *, dilation=1, kernel_size=3,
                         tile_t=1024, interm_dtype=jnp.bfloat16, crop=True):
    """x: (N, C_in, T), aux: (N, D) -- aux is unused (matches PyTorch forward).

    interm_dtype: bf16 for v6e/v7x (bf16 VPU + half the HBM traffic); use
                  jnp.float32 on v5e.
    """
    del aux  # forward() of TCNBlock_Spk_no_aux never uses aux
    N, C_in, T = x.shape
    C_conv = params["w1"].shape[0]
    K = kernel_size
    pad = dilation * (K - 1) // 2

    # --- time tiling: Tt lane-dense, halo fetched at H-lane granularity ---
    H = _round_up(max(pad, 1), 128)
    Tt = max(H, min(_round_up(tile_t, H), _round_up(T, H)))
    assert Tt % 128 == 0 and Tt % H == 0 and pad <= H
    n_t = pl.cdiv(T, Tt)
    TT = n_t * Tt
    R = Tt // H

    cparams = pltpu.CompilerParams(
        dimension_semantics=("parallel", "parallel"),
        vmem_limit_bytes=VMEM_LIMIT)
    smem = pl.BlockSpec(memory_space=pltpu.MemorySpace.SMEM)

    # --- host-side prep (tiny) ---
    xx = jnp.pad(x.astype(interm_dtype), ((0, 0), (0, 0), (0, TT - T)))
    w1 = params["w1"].astype(jnp.bfloat16)
    b1 = params["b1"].astype(jnp.float32)
    a1 = params["a1"].astype(jnp.float32).reshape(1, 1)
    a2 = params["a2"].astype(jnp.float32).reshape(1, 1)
    wd_t = jnp.transpose(params["wd"]).reshape(K, C_conv, 1).astype(interm_dtype)
    bd = params["bd"].astype(interm_dtype)

    # ---------------- stage 1 ----------------
    kern1 = functools.partial(_stage1_kernel, t_valid=T, tile_t=Tt)
    y, s1, ss1 = pl.pallas_call(
        kern1,
        out_shape=(jax.ShapeDtypeStruct((N, C_conv, TT), interm_dtype),
                   jax.ShapeDtypeStruct((N, n_t, 1, 128), jnp.float32),
                   jax.ShapeDtypeStruct((N, n_t, 1, 128), jnp.float32)),
        grid_spec=pltpu.PrefetchScalarGridSpec(
            num_scalar_prefetch=0,
            grid=(N, n_t),
            in_specs=[
                pl.BlockSpec((1, C_in, Tt), lambda n, t: (n, 0, t)),
                pl.BlockSpec((C_conv, C_in), lambda n, t: (0, 0)),
                pl.BlockSpec((C_conv, 1), lambda n, t: (0, 0)),
                smem,
            ],
            out_specs=[
                pl.BlockSpec((1, C_conv, Tt), lambda n, t: (n, 0, t)),
                pl.BlockSpec((1, 1, 1, 128), lambda n, t: (n, t, 0, 0)),
                pl.BlockSpec((1, 1, 1, 128), lambda n, t: (n, t, 0, 0)),
            ]),
        compiler_params=cparams,
    )(xx, w1, b1, a1)

    # gLN1 stats -> per-sample, per-channel scale/shift (tiny host-side math)
    n_elem = float(C_conv * T)
    s1t = jnp.sum(s1[:, :, 0, 0], axis=1)
    ss1t = jnp.sum(ss1[:, :, 0, 0], axis=1)
    m1 = s1t / n_elem
    v1 = jnp.maximum(ss1t / n_elem - m1 * m1, 0.0)
    r1 = jax.lax.rsqrt(v1 + EPS)
    scale1 = params["g1"][None] * r1[:, None, None]            # (N, C_conv, 1)
    shift1 = params["be1"][None] - m1[:, None, None] * scale1
    scale1 = scale1.astype(interm_dtype)
    shift1 = shift1.astype(interm_dtype)

    # ---------------- stage 2 ----------------
    kern2 = functools.partial(_stage2_kernel, t_valid=T, tile_t=Tt, pad=pad,
                              dilation=dilation, kernel_size=K, halo=H)
    y2, s2, ss2 = pl.pallas_call(
        kern2,
        out_shape=(jax.ShapeDtypeStruct((N, C_conv, TT), interm_dtype),
                   jax.ShapeDtypeStruct((N, n_t, 1, 128), jnp.float32),
                   jax.ShapeDtypeStruct((N, n_t, 1, 128), jnp.float32)),
        grid_spec=pltpu.PrefetchScalarGridSpec(
            num_scalar_prefetch=0,
            grid=(N, n_t),
            in_specs=[
                pl.BlockSpec((1, C_conv, Tt), lambda n, t: (n, 0, t)),
                pl.BlockSpec((1, C_conv, H),
                             lambda n, t: (n, 0, jnp.maximum(t * R - 1, 0))),
                pl.BlockSpec((1, C_conv, H),
                             lambda n, t: (n, 0, jnp.minimum((t + 1) * R,
                                                             n_t * R - 1))),
                pl.BlockSpec((1, C_conv, 1), lambda n, t: (n, 0, 0)),
                pl.BlockSpec((1, C_conv, 1), lambda n, t: (n, 0, 0)),
                pl.BlockSpec((K, C_conv, 1), lambda n, t: (0, 0, 0)),
                pl.BlockSpec((C_conv, 1), lambda n, t: (0, 0)),
                smem,
            ],
            out_specs=[
                pl.BlockSpec((1, C_conv, Tt), lambda n, t: (n, 0, t)),
                pl.BlockSpec((1, 1, 1, 128), lambda n, t: (n, t, 0, 0)),
                pl.BlockSpec((1, 1, 1, 128), lambda n, t: (n, t, 0, 0)),
            ]),
        compiler_params=cparams,
    )(y, y, y, scale1, shift1, wd_t, bd, a2)

    # gLN2 stats -> folded into the sconv weights/bias (per sample, tiny)
    s2t = jnp.sum(s2[:, :, 0, 0], axis=1)
    ss2t = jnp.sum(ss2[:, :, 0, 0], axis=1)
    m2 = s2t / n_elem
    v2 = jnp.maximum(ss2t / n_elem - m2 * m2, 0.0)
    r2 = jax.lax.rsqrt(v2 + EPS)
    g2r = params["g2"].reshape(1, 1, C_conv)
    be2r = params["be2"].reshape(1, 1, C_conv)
    scale2 = g2r * r2[:, None, None]                           # (N, 1, C_conv)
    shift2 = be2r - m2[:, None, None] * scale2
    ws = params["ws"].astype(jnp.float32)                      # (C_in, C_conv)
    ws_eff = (ws[None] * scale2).astype(jnp.bfloat16)          # (N, C_in, C_conv)
    b_eff = jnp.sum(ws[None] * shift2, axis=2, keepdims=True) + params["bs"][None]

    # ---------------- stage 3 ----------------
    out = pl.pallas_call(
        _stage3_kernel,
        out_shape=jax.ShapeDtypeStruct((N, C_in, TT), x.dtype),
        grid_spec=pltpu.PrefetchScalarGridSpec(
            num_scalar_prefetch=0,
            grid=(N, n_t),
            in_specs=[
                pl.BlockSpec((1, C_in, C_conv), lambda n, t: (n, 0, 0)),
                pl.BlockSpec((1, C_in, 1), lambda n, t: (n, 0, 0)),
                pl.BlockSpec((1, C_conv, Tt), lambda n, t: (n, 0, t)),
                pl.BlockSpec((1, C_in, Tt), lambda n, t: (n, 0, t)),
            ],
            out_specs=pl.BlockSpec((1, C_in, Tt), lambda n, t: (n, 0, t))),
        compiler_params=cparams,
    )(ws_eff, b_eff, y2, xx)

    return out[:, :, :T] if crop else out


# --------------------------------------------------------------------------
# Pure-JAX f32 reference (same math, no Pallas)
# --------------------------------------------------------------------------
def _reference(x, params, *, dilation=1, kernel_size=3):
    def gln(y, g, b):
        m = jnp.mean(y, axis=(1, 2), keepdims=True)
        v = jnp.mean((y - m) ** 2, axis=(1, 2), keepdims=True)
        return g[None] * (y - m) / jnp.sqrt(v + EPS) + b[None]

    def prelu(y, a):
        return jnp.where(y > 0, y, a * y)

    y = jnp.einsum("oc,nct->not", params["w1"], x) + params["b1"][None]
    y = gln(prelu(y, params["a1"][0, 0]), params["g1"], params["be1"])

    pad = dilation * (kernel_size - 1) // 2
    yp = jnp.pad(y, ((0, 0), (0, 0), (pad, pad)))
    T = x.shape[-1]
    acc = jnp.zeros_like(y)
    for k in range(kernel_size):
        acc = acc + params["wd"][None, :, k:k + 1] * yp[:, :, k * dilation:k * dilation + T]
    y = acc + params["bd"][None]

    y = gln(prelu(y, params["a2"][0, 0]), params["g2"], params["be2"])
    y = jnp.einsum("oc,nct->not", params["ws"], y) + params["bs"][None]
    return y + x


def make_params(key, in_channels, conv_channels, kernel_size):
    ks = jax.random.split(key, 6)
    scale = 0.1
    return {
        "w1": scale * jax.random.normal(ks[0], (conv_channels, in_channels), jnp.float32),
        "b1": scale * jax.random.normal(ks[1], (conv_channels, 1), jnp.float32),
        "a1": jnp.full((1, 1), 0.25, jnp.float32),            # PReLU default init
        "g1": jnp.ones((conv_channels, 1), jnp.float32),       # gLN gamma
        "be1": jnp.zeros((conv_channels, 1), jnp.float32),     # gLN beta
        "wd": scale * jax.random.normal(ks[2], (conv_channels, kernel_size), jnp.float32),
        "bd": scale * jax.random.normal(ks[3], (conv_channels, 1), jnp.float32),
        "a2": jnp.full((1, 1), 0.25, jnp.float32),
        "g2": jnp.ones((conv_channels, 1), jnp.float32),
        "be2": jnp.zeros((conv_channels, 1), jnp.float32),
        "ws": scale * jax.random.normal(ks[4], (in_channels, conv_channels), jnp.float32),
        "bs": scale * jax.random.normal(ks[5], (in_channels, 1), jnp.float32),
    }


if __name__ == "__main__":
    N, C_IN, C_CONV, T = 2, 16, 32, 200
    SPK_DIM, K = 100, 3

    key = jax.random.PRNGKey(0)
    kx, kaux, kp = jax.random.split(key, 3)
    x = jax.random.normal(kx, (N, C_IN, T), jnp.float32)
    aux = jax.random.normal(kaux, (N, SPK_DIM), jnp.float32)  # unused by forward
    params = make_params(kp, C_IN, C_CONV, K)

    # tile_t=128 forces multiple time tiles (n_t=2) so the halo path and the
    # two-pass gLN partial-sum combination are exercised at small shapes.
    for dil in (1, 2):
        out = tcn_block_spk_no_aux(x, aux, params, dilation=dil,
                                   kernel_size=K, tile_t=128)
        out = jax.block_until_ready(out)
        ref = _reference(x, params, dilation=dil, kernel_size=K)
        assert out.shape == (N, C_IN, T)
        # bf16 intermediates / bf16 MXU inputs (f32 accumulate) vs f32 reference.
        assert jnp.allclose(out, ref, atol=5e-2, rtol=5e-2), f"mismatch dil={dil}"

    print("KERNEL_OK")
</pallas_src>

<mosaic_0001>
module attributes {stable_mosaic.version = 11 : i64} {
  func.func @_stage1_kernel(%arg0: i32, %arg1: i32, %arg2: memref<1x16x128xbf16, #tpu.memory_space<vmem>>, %arg3: memref<32x16xbf16, #tpu.memory_space<vmem>>, %arg4: memref<32x1xf32, #tpu.memory_space<vmem>>, %arg5: memref<1x1xf32, #tpu.memory_space<smem>>, %arg6: memref<1x32x128xbf16, #tpu.memory_space<vmem>>, %arg7: memref<1x1x1x128xf32, #tpu.memory_space<vmem>>, %arg8: memref<1x1x1x128xf32, #tpu.memory_space<vmem>>) attributes {dimension_semantics = [#tpu.dimension_semantics<parallel>, #tpu.dimension_semantics<parallel>], iteration_bounds = array<i64: 2, 2>, scalar_prefetch = 0 : i64, scratch_operands = 0 : i64, tpu.core_type = #tpu.core_type<tc>, window_params = [{transform_indices = @transform_0, window_bounds = array<i64: 1, 16, 128>}, {pipeline_mode = #tpu.pipeline_mode<synchronous>, transform_indices = @transform_1, window_bounds = array<i64: 32, 16>}, {pipeline_mode = #tpu.pipeline_mode<synchronous>, transform_indices = @transform_2, window_bounds = array<i64: 32, 1>}, {transform_indices = @transform_3, window_bounds = array<i64: 1, 1>}, {transform_indices = @transform_4, window_bounds = array<i64: 1, 32, 128>}, {transform_indices = @transform_5, window_bounds = array<i64: 1, 1, 1, 128>}, {transform_indices = @transform_6, window_bounds = array<i64: 1, 1, 1, 128>}]} {
    %c0 = arith.constant 0 : index
    %c0_0 = arith.constant 0 : index
    %0 = vector.load %arg3[%c0, %c0_0] : memref<32x16xbf16, #tpu.memory_space<vmem>>, vector<32x16xbf16>
    %c0_1 = arith.constant 0 : index
    %c0_2 = arith.constant 0 : index
    %c0_3 = arith.constant 0 : index
    %1 = vector.load %arg2[%c0_1, %c0_2, %c0_3] : memref<1x16x128xbf16, #tpu.memory_space<vmem>>, vector<1x16x128xbf16>
    %2 = vector.shape_cast %1 : vector<1x16x128xbf16> to vector<16x128xbf16>
    %cst = arith.constant dense<0.000000e+00> : vector<32x128xf32>
    %3 = tpu.matmul %0, %2, %cst {dimension_numbers = #tpu.dot_dimension_numbers<[1], [0], [0], [1], [0, 0, 1, 1], [], []>} : vector<32x16xbf16>, vector<16x128xbf16>, vector<32x128xf32> -> vector<32x128xf32>
    %c0_4 = arith.constant 0 : index
    %c0_5 = arith.constant 0 : index
    %4 = vector.load %arg4[%c0_4, %c0_5] : memref<32x1xf32, #tpu.memory_space<vmem>>, vector<32x1xf32>
    %5 = vector.broadcast %4 : vector<32x1xf32> to vector<32x128xf32>
    %6 = arith.addf %3, %5 : vector<32x128xf32>
    %c128_i32 = arith.constant 128 : i32
    %7 = arith.muli %arg1, %c128_i32 : i32
    %8 = tpu.iota {dimensions = array<i32: 1>} : vector<1x128xi32>
    %9 = vector.broadcast %7 : i32 to vector<1x128xi32>
    %10 = arith.addi %9, %8 : vector<1x128xi32>
    %c200_i32 = arith.constant 200 : i32
    %11 = vector.broadcast %c200_i32 : i32 to vector<1x128xi32>
    %12 = arith.cmpi slt, %10, %11 : vector<1x128xi32>
    %c0_6 = arith.constant 0 : index
    %c0_7 = arith.constant 0 : index
    %13 = memref.load %arg5[%c0_6, %c0_7] : memref<1x1xf32, #tpu.memory_space<smem>>
    %cst_8 = arith.constant 0.000000e+00 : f32
    %14 = vector.broadcast %cst_8 : f32 to vector<32x128xf32>
    %15 = arith.cmpf ogt, %6, %14 : vector<32x128xf32>
    %16 = vector.broadcast %13 : f32 to vector<32x128xf32>
    %17 = arith.mulf %16, %6 : vector<32x128xf32>
    %18 = arith.select %15, %6, %17 : vector<32x128xi1>, vector<32x128xf32>
    %cst_9 = arith.constant 0.000000e+00 : f32
    %19 = vector.shape_cast %12 : vector<1x128xi1> to vector<1x128xi1>
    %20 = vector.broadcast %19 : vector<1x128xi1> to vector<32x128xi1>
    %21 = vector.broadcast %cst_9 : f32 to vector<32x128xf32>
    %22 = arith.select %20, %18, %21 : vector<32x128xi1>, vector<32x128xf32>
    %23 = arith.truncf %22 : vector<32x128xf32> to vector<32x128xbf16>
    %c0_10 = arith.constant 0 : index
    %c0_11 = arith.constant 0 : index
    %c0_12 = arith.constant 0 : index
    %24 = vector.load %arg6[%c0_10, %c0_11, %c0_12] : memref<1x32x128xbf16, #tpu.memory_space<vmem>>, vector<1x32x128xbf16>
    %25 = vector.shape_cast %24 : vector<1x32x128xbf16> to vector<32x128xbf16>
    %26 = vector.shape_cast %23 : vector<32x128xbf16> to vector<1x32x128xbf16>
    tpu.vector_store %arg6[%c0_10, %c0_11, %c0_12], %26 {strides = array<i32>} : memref<1x32x128xbf16, #tpu.memory_space<vmem>>, vector<1x32x128xbf16>,
    %27 = vector.shape_cast %22 : vector<32x128xf32> to vector<1x32x128xf32>
    %cst_13 = arith.constant dense<0.000000e+00> : vector<1xf32>
    %28 = vector.multi_reduction <add>, %27, %cst_13 [1, 2] : vector<1x32x128xf32> to vector<1xf32>
    %29 = vector.shape_cast %28 : vector<1xf32> to vector<1x1x1xf32>
    %30 = vector.extract %29[0, 0, 0] : f32 from vector<1x1x1xf32>
    %31 = vector.broadcast %30 : f32 to vector<1x128xf32>
    %c0_14 = arith.constant 0 : index
    %c0_15 = arith.constant 0 : index
    %c0_16 = arith.constant 0 : index
    %c0_17 = arith.constant 0 : index
    %32 = vector.load %arg7[%c0_14, %c0_15, %c0_16, %c0_17] : memref<1x1x1x128xf32, #tpu.memory_space<vmem>>, vector<1x1x1x128xf32>
    %33 = vector.shape_cast %32 : vector<1x1x1x128xf32> to vector<1x128xf32>
    %34 = vector.shape_cast %31 : vector<1x128xf32> to vector<1x1x1x128xf32>
    tpu.vector_store %arg7[%c0_14, %c0_15, %c0_16, %c0_17], %34 {strides = array<i32>} : memref<1x1x1x128xf32, #tpu.memory_space<vmem>>, vector<1x1x1x128xf32>,
    %35 = arith.mulf %22, %22 : vector<32x128xf32>
    %36 = vector.shape_cast %35 : vector<32x128xf32> to vector<1x32x128xf32>
    %cst_18 = arith.constant dense<0.000000e+00> : vector<1xf32>
    %37 = vector.multi_reduction <add>, %36, %cst_18 [1, 2] : vector<1x32x128xf32> to vector<1xf32>
    %38 = vector.shape_cast %37 : vector<1xf32> to vector<1x1x1xf32>
    %39 = vector.extract %38[0, 0, 0] : f32 from vector<1x1x1xf32>
    %40 = vector.broadcast %39 : f32 to vector<1x128xf32>
    %c0_19 = arith.constant 0 : index
    %c0_20 = arith.constant 0 : index
    %c0_21 = arith.constant 0 : index
    %c0_22 = arith.constant 0 : index
    %41 = vector.load %arg8[%c0_19, %c0_20, %c0_21, %c0_22] : memref<1x1x1x128xf32, #tpu.memory_space<vmem>>, vector<1x1x1x128xf32>
    %42 = vector.shape_cast %41 : vector<1x1x1x128xf32> to vector<1x128xf32>
    %43 = vector.shape_cast %40 : vector<1x128xf32> to vector<1x1x1x128xf32>
    tpu.vector_store %arg8[%c0_19, %c0_20, %c0_21, %c0_22], %43 {strides = array<i32>} : memref<1x1x1x128xf32, #tpu.memory_space<vmem>>, vector<1x1x1x128xf32>,
    return
  }
  func.func @transform_0(%arg0: i32, %arg1: i32) -> (i32, i32, i32) {
    %c0_i32 = arith.constant 0 : i32
    %c0_i32_0 = arith.constant 0 : i32
    return %arg0, %c0_i32, %arg1 : i32, i32, i32
  }
  func.func @transform_1(%arg0: i32, %arg1: i32) -> (i32, i32) {
    %c0_i32 = arith.constant 0 : i32
    %c0_i32_0 = arith.constant 0 : i32
    %c0_i32_1 = arith.constant 0 : i32
    return %c0_i32, %c0_i32_0 : i32, i32
  }
  func.func @transform_2(%arg0: i32, %arg1: i32) -> (i32, i32) {
    %c0_i32 = arith.constant 0 : i32
    %c0_i32_0 = arith.constant 0 : i32
    %c0_i32_1 = arith.constant 0 : i32
    return %c0_i32, %c0_i32_0 : i32, i32
  }
  func.func @transform_3(%arg0: i32, %arg1: i32) -> (i32, i32) {
    %c0_i32 = arith.constant 0 : i32
    %c0_i32_0 = arith.constant 0 : i32
    %c0_i32_1 = arith.constant 0 : i32
    return %c0_i32, %c0_i32_0 : i32, i32
  }
  func.func @transform_4(%arg0: i32, %arg1: i32) -> (i32, i32, i32) {
    %c0_i32 = arith.constant 0 : i32
    %c0_i32_0 = arith.constant 0 : i32
    return %arg0, %c0_i32, %arg1 : i32, i32, i32
  }
  func.func @transform_5(%arg0: i32, %arg1: i32) -> (i32, i32, i32, i32) {
    %c0_i32 = arith.constant 0 : i32
    %c0_i32_0 = arith.constant 0 : i32
    %c0_i32_1 = arith.constant 0 : i32
    return %arg0, %arg1, %c0_i32, %c0_i32_0 : i32, i32, i32, i32
  }
  func.func @transform_6(%arg0: i32, %arg1: i32) -> (i32, i32, i32, i32) {
    %c0_i32 = arith.constant 0 : i32
    %c0_i32_0 = arith.constant 0 : i32
    %c0_i32_1 = arith.constant 0 : i32
    return %arg0, %arg1, %c0_i32, %c0_i32_0 : i32, i32, i32, i32
  }
}

</mosaic_0001>

<bundles_post_ra>
// kernel: tpu_custom_call.1
= control target key start
LH: loop header
LB: loop body
LE: loop exit
PB: predicated region body
PF: predicated region fallthrough
CT: control target
= control target key end

     0   :  { %s1303_s0 = inlined_call_operand.vmem [shape: bf16[2,16,256], index: 0, kind: input, shape index: {}]   ;;  %s1304_s1 = inlined_call_operand.vmem [shape: bf16[32,16], index: 1, kind: input, shape index: {}]   ;;  %s1305_s2 = inlined_call_operand.vmem [shape: f32[32,1], index: 2, kind: input, shape index: {}]   ;;  %s1306_s3 = inlined_call_operand.<no memory space> [shape: f32[1,1], index: 3, kind: input, shape index: {}]   ;;  %s1307_s4 = inlined_call_operand.hbm [shape: bf16[2,32,256], index: 4, kind: output, shape index: {0}]   ;;  %s1308_s5 = inlined_call_operand.hbm [shape: f32[2,2,1,128], index: 5, kind: output, shape index: {1}]   ;;  %s1309_s6 = inlined_call_operand.hbm [shape: f32[2,2,1,128], index: 6, kind: output, shape index: {2}]  }
   0x1   :  { %1313 = sst [smem:[#allocation11_spill]] %s1303_s0 }
   0x2   :  { %1314 = sst [smem:[#allocation12_spill]] %s1304_s1 }
   0x3   :  { %12 = sst [smem:[#allocation2]] %s1306_s3 }
   0x4   :  { %13 = vsyncpa [#allocation5], 0 }
   0x5   :  { %15 = vsyncpa [#allocation5 + $0x1], 0 }
   0x6   :  { %16 = vsyncpa [#allocation7], 0 }
   0x7   :  { %18 = vsyncpa [#allocation7 + $0x1], 0  ;;  %s1052_s23 = smov 0   ;;  %s1054_s24 = smov 0  }
   0x8   :  { %s1056_s25 = smov 0   ;;  %s1058_s26 = smov 0  }
   0x9   :  { %s1060_s27 = smov 0   ;;  %s1062_s28 = smov 0  }
   0xa   :  { %s1064_s29 = smov 0   ;;  %s1066_s30 = smov 0  }
   0xb LB: > { %s1311_s3 = sadd.s32 4294967295, %s1005_s30   ;;  %s1310_s7 = sadd.s32 4294967294, %s1005_s30   ;;  %s1005_s30 = sphi %s1066_s30, %s24_s30   ;;  %s1001_s29 = sphi %s1064_s29, %s1329_s29   ;;  %s997_s28 = sphi %s1062_s28, %s1328_s28   ;;  %s993_s27 = sphi %s1060_s27, %s1327_s27   ;;  %s989_s26 = sphi %s1058_s26, %s1326_s26   ;;  %s985_s25 = sphi %s1056_s25, %s1325_s25   ;;  %s981_s24 = sphi %s1054_s24, %s1324_s24   ;;  %s977_s23 = sphi %s1052_s23, %s1323_s23  }
   0xc   : > { %s33_s8 = sadd.s32 1, %s997_s28  ;;  %s36_s9 = sadd.s32 1, %s1001_s29 }
   0xd   : > { %p34_p0 = scmp.ge.s32.totalorder %s33_s8, 2  ;;  %p52_p1 = scmp.ne.s32.totalorder %s985_s25, %s981_s24 }
   0xe   : > { %p53_p2 = scmp.eq.s32.totalorder %s1005_s30, 0  ;;  %p147_p5 = scmp.eq.s32.totalorder %s1311_s3, 3 }
   0xf   : > { %s1331_s8 = smov (%p34_p0, %s33_s8), 0  ;;  %s1333_s9 = smov (!%p34_p0, %s36_s9), %s1001_s29 }
  0x10   : > { %s41_s10 = ssub.s32 %s997_s28, %s1331_s8  ;;  %p1104_p3 = por %p53_p2, %p52_p1 }
  0x11   : > { %p38_p4 = scmp.ge.s32.totalorder %s1333_s9, 2  ;;  %p152_p6 = scmp.ne.s32.totalorder %s981_s24, %s977_s23 }
  0x12   : > { %p153_p7 = scmp.eq.s32.totalorder %s1310_s7, 3  ;;  %p1116_p8 = por %p147_p5, %p52_p1 }
  0x13   : > { %s1335_s9 = smov (%p38_p4, %s1333_s9), 0  ;;  %s45_s16 = sadd.s32 1, %s985_s25 }
  0x14   : > { %p1120_p9 = por %p153_p7, %p152_p6  ;;  %s40_s14 = ssub.s32 %s1001_s29, %s1335_s9 }
  0x15   : > { %s42_s15 = sor.u32 %s41_s10, %s40_s14  ;;  %p713_p11 = scmp.ge.s32.totalorder %s1005_s30, 4 }
  0x16   : > { %p43_p10 = scmp.eq.s32.totalorder %s42_s15, 0 }
  0x17   : > { %234 = sbr.rel (%p713_p11) target bundleno = 39 (0x27), region = 28 }
  0x18   : > { %s1128_s17 = scalar_select %p43_p10, %s985_s25, %s45_s16  }
  0x1c   : > { %237 = sbr.rel (!%p1104_p3) target bundleno = 39 (0x27), region = 32  ;;  %s239_s18 = sand.u32 (%p1104_p3), 1, %s985_s25  }
  0x1d   : > { %s715_s19 = sshll.u32 (%p1104_p3), %s1001_s29, 2  ;;  %s714_s20 = sshll.u32 (%p1104_p3), %s239_s18, 3 }
  0x1e   : > { %s243_s21 = sadd.s32 (%p1104_p3), %s997_s28, %s715_s19  ;;  %s1318_s0 = sld [smem:[#allocation11_spill]] (%p1104_p3) }
  0x1f   : > { %s716_s22 = sshll.u32 (%p1104_p3), %s243_s21, 2  ;;  %s241_s15 = scalar_lea.vmem (%p1104_p3), [#allocation3], %s714_s20 }
  0x24   : > { %s245_s14 = scalar_lea.vmem %s1318_s0, %s716_s22 }
  0x25   : > { %v262_v0 = vld [vmem:[%s245_s14] sm:$0xf]  ;;  %v264_v1 = vld [vmem:[%s245_s14 + $0x8] sm:$0xf] }
  0x26   : > { %263 = vst [vmem:[%s241_s15] sm:$0xf] %v262_v0  ;;  %265 = vst [vmem:[%s241_s15 + $0x4] sm:$0xf] %v264_v1 }
  0x27 PF: > { %p717_p12 = scmp.ge.s32.totalorder %s1005_s30, 1  ;;  %p292_p13 = scmp.lt.s32.totalorder %s1005_s30, 5 }
  0x29   : > { %p293_p0 = pnand %p717_p12, %p292_p13 }
  0x2a   : > { %s1142_s11 = sand.u32 (!%p293_p0), 1, %s981_s24   ;;  %s1319_s1 = sld [smem:[#allocation12_spill]] (!%p293_p0) }
  0x2b   : > { %296 = sbr.rel (%p293_p0) target bundleno = 508 (0x1fc), region = 73  ;;  %s718_s7 = sshll.u32 (!%p293_p0), %s1142_s11, 3 }
  0x2c   : > { %s301_s10 = scalar_lea.vmem (!%p293_p0), [#allocation3], %s718_s7  ;;  %s445_s7 = sld [smem:[#allocation2]] (!%p293_p0) }
  0x2d   : > { %s725_s21 = sshll.u32 (!%p293_p0), %s989_s26, 7  ;;  %s719_s22 = sshll.u32 (!%p293_p0), %s1142_s11, 4 }
  0x2e   : > { %s731_s15 = sshll.u32 (!%p293_p0), %s993_s27, 3 }
  0x2f   : > { %s537_s16 = sadd.s32 (!%p293_p0), %s989_s26, %s731_s15 }
  0x30   : > { %v855_v2 = vld [vmem:[%s1319_s1] sm:$0xff]   ;;  %vm383_vm0 = vcmask 130048   ;;  %v345_v4 = vld [vmem:[%s1305_s2 + $0x10] sm:$0xff]  ;;  %v1007_v6 = vmov 0   ;;  %v856_v7 = vld [vmem:[%s1319_s1 + $0x8] sm:$0xff]   ;;  %v440_v10 = vlaneseq  ;;  %v442_v13 = vstv %s725_s21  ;;  %s732_s18 = sshll.u32 %s537_s16, 6 }
  0x31   : > { %759 = vmatprep.mubr.msk.bf16.mxu0 %vm383_vm0, %v855_v2  ;;  %v343_v3 = vld [vmem:[%s1305_s2] sm:$0xff]  ;;  %852 = vset.pattern.permute.xlu0 %v1007_v6  ;;  %v344_v8 = vld [vmem:[%s1305_s2 + $0x8] sm:$0xff]  ;;  %v346_v9 = vld [vmem:[%s1305_s2 + $0x18] sm:$0xff]  ;;  %s518_s21 = scalar_lea.sflag [#allocation5], %s1142_s11 }
  0x32   : > { %v854_v5 = vld [vmem:[%s301_s10] sm:$0xff]   ;;  %853 = vset.pattern.permute.xlu1 %v1007_v6  ;;  %349 = vperm.xlu0 %852, %v343_v3   ;;  %v441_v12 = vand.u32 127, %v440_v10  ;;  %v450_v16 = vstv %s445_s7  ;;  %s323_s10 = scalar_lea.vmem [#allocation4], %s719_s22  ;;  %s1174_s7 = scalar_lea.hbm %s1307_s4, %s732_s18 }
  0x33   : > { %359 = vperm.xlu1 %853, %v345_v4   ;;  %757 = vmatprep.subr.bf16.mxu0 %v854_v5  ;;  %s540_s14 = sshll.u32 %s323_s10, 4  ;;  %s1167_s14 = int_to_ptr.vmem [resolvable:$true] %s540_s14 }
  0x34   : > { %758 = vmatpush3.bf16.msra.mxu0 %v854_v5  ;;  %v443_v19 = vadd.s32 %v442_v13, %v441_v12  ;;  %s857_s22 = scalar_lea.vmem %s1167_s14, 256 }
  0x35   : > { %p858_p1 = scmp.ne.s32.totalorder %s1167_s14, %s857_s22 }
  0x36   : > { %354 = vperm.xlu0 %852, %v344_v8   ;;  %vm444_vm3 = vcmp.lt.s32.totalorder %v443_v19, 200 }
  0x37   : > { %364 = vperm.xlu1 %853, %v346_v9   ;;  %760 = vmatmul.mubr.msk.bf16.vlgmr.msra.gmra.mxu0 %vm383_vm0, %v856_v7  ;;  %p859_p2 = pnand %p858_p1, %p1116_p8 }
  0x39   : > { %p860_p3 = pneg %p859_p2 }
  0xad   : > { %v350_v14 = vpop.permute.xlu0 %349 }
  0xae   : > { %v360_v11 = vpop.permute.xlu1 %359 }
  0xb1   : > { %v355_v27 = vpop.permute.xlu0 %354 }
  0xb2   : > { %v365_v20 = vpop.permute.xlu1 %364 }
  0xf7   : > { %v761_v15 = vpop.f32.mrf.mxu0 }
  0xf8   : > { %v433_v17 = vadd.f32 %v761_v15, %v360_v11 }
  0xf9   : > { %v424_v18 = vpop.f32.mrf.mxu0 }
  0xfa   : > { %vm448_vm1 = vcmp.gt.f32.partialorder %v433_v17, 0.0  ;;  %v453_v21 = vmul.f32 %v450_v16, %v433_v17  ;;  %v425_v22 = vadd.f32 %v424_v18, %v350_v14 }
  0xfb   : > { %v762_v23 = vpop.f32.mrf.mxu0 }
  0xfc   : > { %vm446_vm2 = vcmp.gt.f32.partialorder %v425_v22, 0.0  ;;  %v451_v24 = vmul.f32 %v450_v16, %v425_v22  ;;  %v436_v25 = vadd.f32 %v762_v23, %v365_v20  ;;  %v457_v26 = vsel %vm448_vm1, %v433_v17, %v453_v21 }
  0xfd   : > { %v427_v28 = vpop.f32.mrf.mxu0  ;;  %v463_v35 = vsel %vm444_vm3, %v457_v26, 0.0 }
  0xfe   : > { %v455_v29 = vsel %vm446_vm2, %v425_v22, %v451_v24  ;;  %vm449_vm4 = vcmp.gt.f32.partialorder %v436_v25, 0.0  ;;  %v454_v30 = vmul.f32 %v450_v16, %v436_v25  ;;  %v428_v31 = vadd.f32 %v427_v28, %v355_v27 }
  0xff   : > { %v461_v34 = vsel %vm444_vm3, %v455_v29, 0.0  ;;  %v501_v45 = vmul.f32 %v463_v35, %v463_v35 }
 0x100   : > { %vm447_vm5 = vcmp.gt.f32.partialorder %v428_v31, 0.0  ;;  %v452_v32 = vmul.f32 %v450_v16, %v428_v31  ;;  %v458_v33 = vsel %vm449_vm4, %v436_v25, %v454_v30  ;;  %v499_v42 = vmul.f32 %v461_v34, %v461_v34 }
 0x101   : > { %v464_v36 = vsel %vm444_vm3, %v458_v33, 0.0 }
 0x102   : > { %v456_v37 = vsel %vm447_vm5, %v428_v31, %v452_v32  ;;  %v751_v38 = vpack.c.bf16 %v464_v36, %v463_v35  ;;  %v502_v48 = vmul.f32 %v464_v36, %v464_v36 }
 0x103   : > { %v462_v39 = vsel %vm444_vm3, %v456_v37, 0.0 }
 0x104   : > { %v746_v40 = vpack.c.bf16 %v462_v39, %v461_v34  ;;  %753 = vst [vmem:[%s323_s10 + $0x8] sm:$0xff] %v751_v38   ;;  %v485_v41 = vadd.f32 %v462_v39, %v461_v34  ;;  %v500_v43 = vmul.f32 %v462_v39, %v462_v39 }
 0x106   : > { %747 = vst [vmem:[%s323_s10] sm:$0xff] %v746_v40   ;;  %v486_v44 = vadd.f32 %v485_v41, %v463_v35  ;;  %v503_v46 = vadd.f32 %v500_v43, %v499_v42  ;;  %s1008_s10 = smov [#allocation4]  }
 0x107   : > { %s861_s3 = sshll.u32 %s1008_s10, 4  ;;  %s862_s3 = int_to_ptr.vmem [resolvable:$false] %s861_s3 }
 0x108   : > { %v487_v47 = vadd.f32 %v486_v44, %v464_v36  ;;  %v504_v49 = vadd.f32 %v503_v46, %v501_v45  ;;  %s863_s0 = scalar_lea.vmem %s862_s3, 512  ;;  %p864_p4 = scmp.lt.s32.totalorder %s1167_s14, %s862_s3 }
 0x109   : > { %p865_p5 = scmp.lt.s32.totalorder %s863_s0, %s857_s22 }
 0x10a   : > { %488 = vadd.xlane.f32.xlu0 %v487_v47  ;;  %v505_v50 = vadd.f32 %v504_v49, %v502_v48 }
 0x10b   : > { %p866_p6 = por %p865_p5, %p864_p4 }
 0x10c   : > { %506 = vadd.xlane.f32.xlu1 %v505_v50 }
 0x10d   : > { %p867_p7 = pnand %p866_p6, %p860_p3 }
 0x10f   : > { %870 = shalt.err (!%p867_p7)
}
 0x110   : > { %s871_s15 = scalar_lea.hbm %s1174_s7, 256  ;;  %s875_s19 = scalar_lea.hbm %s1307_s4, 1024 }
 0x111   : > { %p872_p10 = scmp.ne.s32.totalorder %s1174_s7, %s871_s15  ;;  %p876_p13 = scmp.lt.s32.totalorder %s1174_s7, %s1307_s4 }
 0x112   : > { %p877_p0 = scmp.lt.s32.totalorder %s875_s19, %s871_s15 }
 0x113   : > { %p873_p11 = pnand %p872_p10, %p1116_p8 }
 0x114   : > { %p878_p1 = por %p877_p0, %p876_p13 }
 0x115   : > { %p874_p12 = pneg %p873_p11 }
 0x117   : > { %p879_p2 = pnand %p878_p1, %p874_p12 }
 0x119   : > { %882 = shalt.err (!%p879_p2)
}
 0x11a   : > { %s1009_s0 = smov 64   ;;  %s1010_s3 = smov 128  }
 0x11b   : > { %s1011_s22 = smov 4   ;;  %s329_s18 = scalar_lea.vmem [#allocation6], %s1142_s11 }
 0x11c   : > { %767 = dma.vmem_to_hbm [thread:$0]  (%p1116_p8), %s1167_s14, 256, %s1174_s7, %s518_s21, %s1009_s0, %s1010_s3, %s1011_s22  }
 0x11d   : > { %s733_s14 = sshll.u32 %s993_s27, 1  ;;  %s1320_s21 = sadd.s32 4294967295, %s1005_s30  }
 0x11e   : > { %s554_s7 = sadd.s32 %s989_s26, %s733_s14  ;;  %s1203_s15 = sand.u32 1, %s1320_s21  }
 0x11f   : > { %s734_s16 = sshll.u32 %s554_s7, 4  ;;  %s558_s19 = sshll.u32 %s329_s18, 4  ;;  %s1214_s19 = int_to_ptr.vmem [resolvable:$true] %s558_s19 }
 0x120   : > { %s1312_s20 = scalar_lea.vmem [#allocation8], %s1142_s11  ;;  %s1212_s22 = scalar_lea.hbm %s1308_s5, %s734_s16 }
 0x121   : > { %s573_s10 = sshll.u32 %s1312_s20, 4  ;;  %s1223_s7 = scalar_lea.hbm %s1309_s6, %s734_s16  ;;  %s1216_s10 = int_to_ptr.vmem [resolvable:$true] %s573_s10 }
 0x122   : > { %s523_s21 = scalar_lea.sflag [#allocation7], %s1203_s15  ;;  %s883_s0 = scalar_lea.vmem %s1214_s19, 16 }
 0x123   : > { %p884_p3 = scmp.ne.s32.totalorder %s1214_s19, %s883_s0  ;;  %s1012_s3 = smov [#allocation6]  }
 0x125   : > { %p885_p4 = pnand %p884_p3, %p1116_p8 }
 0x127   : > { %p886_p5 = pneg %p885_p4 }
 0x193   : > { %v489_v51 = vpop.xlane.xlu0 %488 }
 0x194   : > { %v490_v52 = vrot.slane %v489_v51, 4 }
 0x195   : > { %v507_v53 = vpop.xlane.xlu1 %506 }
 0x196   : > { %v491_v54 = vadd.f32 %v490_v52, %v489_v51  ;;  %v508_v55 = vrot.slane %v507_v53, 4 }
 0x198   : > { %v492_v56 = vrot.slane %v491_v54, 2  ;;  %v509_v57 = vadd.f32 %v508_v55, %v507_v53 }
 0x19a   : > { %v510_v58 = vrot.slane %v509_v57, 2  ;;  %v493_v59 = vadd.f32 %v492_v56, %v491_v54 }
 0x19c   : > { %v511_v60 = vadd.f32 %v510_v58, %v509_v57  ;;  %v494_v61 = vrot.slane %v493_v59, 1 }
 0x19e   : > { %v495_v62 = vadd.f32 %v494_v61, %v493_v59  ;;  %v512_v63 = vrot.slane %v511_v60, 1 }
 0x1a0   : > { %763 = vpush %v495_v62  ;;  %v513_v0 = vadd.f32 %v512_v63, %v511_v60 }
 0x1a2   : > { %765 = vpush %v513_v0 }
 0x1d1   : > { %s764_s1 = spop %763 }
 0x1d2   : > { %v497_v1 = vstv %s764_s1  ;;  %s887_s1 = sshll.u32 %s1012_s3, 4  ;;  %s888_s1 = int_to_ptr.vmem [resolvable:$false] %s887_s1 }
 0x1d3   : > { %498 = vst [vmem:[%s329_s18] sm:$0x1] %v497_v1  ;;  %s1218_s26 = spop %765  ;;  %s889_s20 = scalar_lea.vmem %s888_s1, 32 }
 0x1d4   : > { %v515_v2 = vstv %s1218_s26  ;;  %p890_p6 = scmp.lt.s32.totalorder %s1214_s19, %s888_s1  ;;  %p891_p7 = scmp.lt.s32.totalorder %s889_s20, %s883_s0 }
 0x1d6   : > { %p892_p10 = por %p891_p7, %p890_p6 }
 0x1d8   : > { %p893_p11 = pnand %p892_p10, %p886_p5 }
 0x1da   : > { %896 = shalt.err (!%p893_p11)
}
 0x1db   : > { %s897_s16 = scalar_lea.hbm %s1212_s22, 16  ;;  %s901_s27 = scalar_lea.hbm %s1308_s5, 64 }
 0x1dc   : > { %p898_p12 = scmp.ne.s32.totalorder %s1212_s22, %s897_s16  ;;  %p902_p1 = scmp.lt.s32.totalorder %s1212_s22, %s1308_s5 }
 0x1dd   : > { %p903_p2 = scmp.lt.s32.totalorder %s901_s27, %s897_s16 }
 0x1de   : > { %p899_p13 = pnand %p898_p12, %p1116_p8 }
 0x1df   : > { %p904_p3 = por %p903_p2, %p902_p1 }
 0x1e0   : > { %p900_p0 = pneg %p899_p13 }
 0x1e2   : > { %p905_p4 = pnand %p904_p3, %p900_p0 }
 0x1e4   : > { %908 = shalt.err (!%p905_p4)
}
 0x1e5   : > { %768 = dma.vmem_to_hbm [thread:$0]  (%p1116_p8), %s1214_s19, 16, %s1212_s22, %s523_s21  }
 0x1e6   : > { %s1321_s20 = scalar_lea.vmem [#allocation8], %s1142_s11  ;;  %s909_s0 = scalar_lea.vmem %s1216_s10, 16 }
 0x1e7   : > { %516 = vst [vmem:[%s1321_s20] sm:$0x1] %v515_v2  ;;  %p910_p5 = scmp.ne.s32.totalorder %s1216_s10, %s909_s0  ;;  %s1013_s1 = smov [#allocation8]  }
 0x1e8   : > { %s913_s16 = sshll.u32 %s1013_s1, 4  ;;  %s914_s16 = int_to_ptr.vmem [resolvable:$false] %s913_s16 }
 0x1e9   : > { %p911_p6 = pnand %p910_p5, %p1116_p8  ;;  %s915_s18 = scalar_lea.vmem %s914_s16, 32 }
 0x1ea   : > { %p916_p10 = scmp.lt.s32.totalorder %s1216_s10, %s914_s16  ;;  %p917_p11 = scmp.lt.s32.totalorder %s915_s18, %s909_s0 }
 0x1eb   : > { %p912_p7 = pneg %p911_p6 }
 0x1ec   : > { %p918_p12 = por %p917_p11, %p916_p10 }
 0x1ee   : > { %p919_p13 = pnand %p918_p12, %p912_p7 }
 0x1f0   : > { %922 = shalt.err (!%p919_p13)
}
 0x1f1   : > { %s923_s11 = scalar_lea.hbm %s1223_s7, 16  ;;  %s927_s26 = scalar_lea.hbm %s1309_s6, 64 }
 0x1f2   : > { %p924_p0 = scmp.ne.s32.totalorder %s1223_s7, %s923_s11  ;;  %p928_p3 = scmp.lt.s32.totalorder %s1223_s7, %s1309_s6 }
 0x1f3   : > { %p929_p4 = scmp.lt.s32.totalorder %s927_s26, %s923_s11 }
 0x1f4   : > { %p925_p1 = pnand %p924_p0, %p1116_p8 }
 0x1f5   : > { %p930_p5 = por %p929_p4, %p928_p3 }
 0x1f6   : > { %p926_p2 = pneg %p925_p1 }
 0x1f8   : > { %p931_p6 = pnand %p930_p5, %p926_p2 }
 0x1fa   : > { %934 = shalt.err (!%p931_p6)
}
 0x1fb   : > { %769 = dma.vmem_to_hbm [thread:$0]  (%p1116_p8), %s1216_s10, 16, %s1223_s7, %s523_s21  }
 0x1fc PF: > { %p783_p7 = scmp.ge.s32.totalorder %s1005_s30, 2  ;;  %s585_s3 = sand.u32 1, %s977_s23  }
 0x1fd   : > { %s586_s20 = scalar_lea.sflag [#allocation5], %s585_s3 }
 0x1fe   : > { %p774_p10 = pnand %p783_p7, %p1120_p9 }
 0x200   : > { %p775_p11 = pneg %p774_p10 }
 0x202   : > { %968 = dma.done.wait (%p775_p11), %s586_s20, 256  }
 0x203   : > { %970 = vsyncadd (%p775_p11), %s586_s20, 4294967040  ;;  %s1322_s0 = sadd.s32 4294967294, %s1005_s30  }
 0x204   : > { %s594_s12 = sand.u32 1, %s1322_s0  }
 0x205   : > { %s595_s1 = scalar_lea.sflag [#allocation7], %s594_s12 }
 0x206   : > { %972 = dma.done.wait (%p775_p11), %s595_s1, 32  }
 0x207   : > { %974 = vsyncadd (%p775_p11), %s595_s1, 4294967264  ;;  %s24_s30 = sadd.s32 1, %s1005_s30   ;;  %s1323_s23 = smov %s981_s24 }
 0x208   : > { %p21_p8 = scmp.ge.s32.totalorder %s24_s30, 6   ;;  %s1324_s24 = smov %s985_s25 }
 0x209   : > { %s1325_s25 = smov %s1128_s17  ;;  %s1326_s26 = smov %s997_s28 }
 0x20a   : > { %s1327_s27 = smov %s1001_s29  ;;  %s1328_s28 = smov %s1331_s8 }
 0x20b   : > { %s1329_s29 = smov %s1335_s9  ;;  %23 = sbr.rel (!%p21_p8) target bundleno = 11 (0xb), region = 149 }
 0x210   :  { %607 = vsyncpa [#allocation5], 1 }
 0x211   :  { %609 = vsyncpa [#allocation5 + $0x1], 1 }
 0x212   :  { %610 = vsyncpa [#allocation7], 1 }
 0x213   :  { %612 = vsyncpa [#allocation7 + $0x1], 1 }

</bundles_post_ra>
